<compile_context>
chip_gen: v6e
topology: v6e:2x2x1
jax: 0.10.0
libtpu: 0.0.40
codegen_flags: <defaults>
</compile_context>

<pallas_src>
import math

import jax
import jax.numpy as jnp
from jax.experimental import pallas as pl
from jax.experimental.pallas import tpu as pltpu

EPS = 1e-5


# --------------------------------------------------------------------------
# Pallas kernel: fused combination / concat / aggregation MLPs for one tile
# of faces.  Layout: channels on sublanes, faces on lanes (NCL).
# --------------------------------------------------------------------------
def mesh_conv_kernel(sp_ref, st_ref, tex_ref, nb_ref,
                     w_sp_ref, w_stc_ref, w_tex_ref, b_comb_ref,
                     w_self_ref, w_nb_ref, b_cat_ref,
                     w_agg_ref, b_agg_ref,
                     sp_out_ref, st_out_ref):
    sp = sp_ref[0]   # (c_sp_in,  tile_n)
    st = st_ref[0]   # (c_st_in,  tile_n)
    tx = tex_ref[0]  # (c_tex_in, tile_n)

    # ---- spatial branch: combination_mlp on the channel-concat, realized as
    # a sum of three matmuls (BN + conv bias folded into W / b).
    y = (jnp.dot(w_sp_ref[...], sp, preferred_element_type=jnp.float32)
         + jnp.dot(w_stc_ref[...], st, preferred_element_type=jnp.float32)
         + jnp.dot(w_tex_ref[...], tx, preferred_element_type=jnp.float32)
         + b_comb_ref[...])
    sp_out_ref[0] = jnp.maximum(y, 0.0)

    # ---- structural branch ('Concat'): self contribution computed once,
    # per-neighbor contribution added, relu, max over the 3 neighbors,
    # then aggregation_mlp.
    a = jnp.dot(w_self_ref[...], st, preferred_element_type=jnp.float32) + b_cat_ref[...]

    def branch(k):
        return jnp.maximum(
            a + jnp.dot(w_nb_ref[...], nb_ref[0, k],
                        preferred_element_type=jnp.float32), 0.0)

    m = jnp.maximum(jnp.maximum(branch(0), branch(1)), branch(2))
    z = jnp.dot(w_agg_ref[...], m, preferred_element_type=jnp.float32) + b_agg_ref[...]
    st_out_ref[0] = jnp.maximum(z, 0.0)


# --------------------------------------------------------------------------
# Parameter initialization (deterministic, PyTorch-like shapes).
# --------------------------------------------------------------------------
def init_params(key, c_sp_in, c_st_in, c_tex_in, c_sp_out, c_st_out):
    def layer(k, cin, cout):
        ks = jax.random.split(k, 6)
        bound = 1.0 / math.sqrt(cin)
        w = jax.random.uniform(ks[0], (cout, cin), jnp.float32, -bound, bound)
        b = jax.random.uniform(ks[1], (cout,), jnp.float32, -bound, bound)
        gamma = jax.random.uniform(ks[2], (cout,), jnp.float32, 0.5, 1.5)
        beta = jax.random.uniform(ks[3], (cout,), jnp.float32, -0.1, 0.1)
        mean = jax.random.uniform(ks[4], (cout,), jnp.float32, -0.1, 0.1)
        var = jax.random.uniform(ks[5], (cout,), jnp.float32, 0.5, 1.5)
        return (w, b, gamma, beta, mean, var)

    k1, k2, k3 = jax.random.split(key, 3)
    return {
        'comb': layer(k1, c_sp_in + c_st_in + c_tex_in, c_sp_out),  # combination_mlp
        'cat':  layer(k2, 2 * c_st_in, c_st_in),                    # concat_mlp ('Concat')
        'agg':  layer(k3, c_st_in, c_st_out),                       # aggregation_mlp
    }


def _fold(layer_params):
    """Fold Conv(k=1) bias + inference BatchNorm into (W_eff, bias column)."""
    w, b, gamma, beta, mean, var = layer_params
    scale = gamma / jnp.sqrt(var + EPS)
    w_eff = (w * scale[:, None]).astype(jnp.float32)
    b_eff = (scale * (b - mean) + beta).reshape(-1, 1).astype(jnp.float32)
    return w_eff, b_eff


def _prepare_kernel_params(params, c_sp_in, c_st_in):
    w_comb, b_comb = _fold(params['comb'])   # (c_sp_out, c_sp_in+c_st_in+c_tex_in)
    w_cat, b_cat = _fold(params['cat'])      # (c_st_in, 2*c_st_in)
    w_agg, b_agg = _fold(params['agg'])      # (c_st_out, c_st_in)

    # Split the combination weight by input channel group (avoids the concat)
    w_sp = w_comb[:, :c_sp_in]
    w_stc = w_comb[:, c_sp_in:c_sp_in + c_st_in]
    w_tex = w_comb[:, c_sp_in + c_st_in:]
    # Split the concat_mlp weight into self / neighbor halves
    w_self = w_cat[:, :c_st_in]
    w_nb = w_cat[:, c_st_in:]

    return [w_sp, w_stc, w_tex, b_comb, w_self, w_nb, b_cat, w_agg, b_agg]


# --------------------------------------------------------------------------
# Wrapper.
# --------------------------------------------------------------------------
def _round_up(x, m):
    return ((x + m - 1) // m) * m


def _pad_last(x, n_pad):
    pad = n_pad - x.shape[-1]
    if pad == 0:
        return x
    cfg = [(0, 0)] * (x.ndim - 1) + [(0, pad)]
    return jnp.pad(x, cfg)


def mesh_convolution(spatial_fea, structural_fea, neighbor_index, tex_fea,
                     params, *, tile_n=512):
    """aggregation_method='Concat' forward.  Inputs in NCL layout (B, C, N)."""
    assert tile_n % 128 == 0
    B, c_sp_in, N = spatial_fea.shape
    c_st_in = structural_fea.shape[1]
    c_tex_in = tex_fea.shape[1]

    plist = _prepare_kernel_params(params, c_sp_in, c_st_in)
    c_sp_out = plist[0].shape[0]
    c_st_out = plist[7].shape[0]

    # Data-dependent neighbor gather (torch.gather equivalent) in the wrapper.
    # gathered[b, c, n, k] = structural_fea[b, c, neighbor_index[b, n, k]]
    gathered = jax.vmap(lambda s, ix: s[:, ix])(structural_fea, neighbor_index)
    nb = jnp.transpose(gathered, (0, 3, 1, 2))          # (B, 3, c_st_in, N)

    # Lane-dense tiling: faces on lanes, padded to a multiple of tile_n.
    tile_n = min(tile_n, _round_up(N, 128))
    n_pad = tile_n * pl.cdiv(N, tile_n)

    sp = _pad_last(spatial_fea.astype(jnp.float32), n_pad)
    st = _pad_last(structural_fea.astype(jnp.float32), n_pad)
    tx = _pad_last(tex_fea.astype(jnp.float32), n_pad)
    nb = _pad_last(nb.astype(jnp.float32), n_pad)

    def feat_spec(c):
        return pl.BlockSpec((1, c, tile_n), lambda b, i: (b, 0, i))

    weight_specs = [pl.BlockSpec(p.shape, lambda b, i: (0, 0)) for p in plist]

    in_specs = [feat_spec(c_sp_in), feat_spec(c_st_in), feat_spec(c_tex_in),
                pl.BlockSpec((1, 3, c_st_in, tile_n), lambda b, i: (b, 0, 0, i))
                ] + weight_specs
    out_specs = [pl.BlockSpec((1, c_sp_out, tile_n), lambda b, i: (b, 0, i)),
                 pl.BlockSpec((1, c_st_out, tile_n), lambda b, i: (b, 0, i))]

    sp_out, st_out = pl.pallas_call(
        mesh_conv_kernel,
        out_shape=(jax.ShapeDtypeStruct((B, c_sp_out, n_pad), jnp.float32),
                   jax.ShapeDtypeStruct((B, c_st_out, n_pad), jnp.float32)),
        grid=(B, n_pad // tile_n),
        in_specs=in_specs,
        out_specs=out_specs,
        compiler_params=pltpu.CompilerParams(
            dimension_semantics=("parallel", "parallel")),
    )(sp, st, tx, nb, *plist)

    return sp_out[:, :, :N], st_out[:, :, :N]


# --------------------------------------------------------------------------
# Pure-JAX reference (mirrors the PyTorch module, 'Concat' path).
# --------------------------------------------------------------------------
def reference(spatial_fea, structural_fea, neighbor_index, tex_fea, params):
    def bn(z, gamma, beta, mean, var, extra_dims):
        shape = (1, -1) + (1,) * extra_dims
        return (gamma.reshape(shape) * (z - mean.reshape(shape))
                / jnp.sqrt(var.reshape(shape) + EPS) + beta.reshape(shape))

    def conv_bn_relu_1d(x, layer):
        w, b, gamma, beta, mean, var = layer
        z = jnp.einsum('oc,bcn->bon', w, x) + b[None, :, None]
        return jnp.maximum(bn(z, gamma, beta, mean, var, 1), 0.0)

    def conv_bn_relu_2d(x, layer):
        w, b, gamma, beta, mean, var = layer
        z = jnp.einsum('oc,bcnk->bonk', w, x) + b[None, :, None, None]
        return jnp.maximum(bn(z, gamma, beta, mean, var, 2), 0.0)

    sp_out = conv_bn_relu_1d(
        jnp.concatenate([spatial_fea, structural_fea, tex_fea], axis=1),
        params['comb'])

    B, c_st, N = structural_fea.shape
    gathered = jax.vmap(lambda s, ix: s[:, ix])(structural_fea, neighbor_index)
    self_exp = jnp.broadcast_to(structural_fea[:, :, :, None], (B, c_st, N, 3))
    cat_feat = jnp.concatenate([self_exp, gathered], axis=1)   # (B, 2*c_st, N, 3)
    h = conv_bn_relu_2d(cat_feat, params['cat'])
    m = jnp.max(h, axis=3)
    st_out = conv_bn_relu_1d(m, params['agg'])
    return sp_out, st_out


if __name__ == "__main__":
    key = jax.random.PRNGKey(0)
    k_par, k_sp, k_st, k_tex, k_nb = jax.random.split(key, 5)

    B, N = 2, 200                       # N=200 exercises lane padding to 256
    c_sp_in, c_st_in, c_tex_in = 16, 16, 8
    c_sp_out, c_st_out = 32, 32

    params = init_params(k_par, c_sp_in, c_st_in, c_tex_in, c_sp_out, c_st_out)

    spatial_fea = jax.random.normal(k_sp, (B, c_sp_in, N), jnp.float32)
    structural_fea = jax.random.normal(k_st, (B, c_st_in, N), jnp.float32)
    tex_fea = jax.random.normal(k_tex, (B, c_tex_in, N), jnp.float32)
    neighbor_index = jax.random.randint(k_nb, (B, N, 3), 0, N, jnp.int32)

    sp_out, st_out = mesh_convolution(spatial_fea, structural_fea,
                                      neighbor_index, tex_fea, params,
                                      tile_n=128)
    sp_out = jax.block_until_ready(sp_out)
    st_out = jax.block_until_ready(st_out)

    sp_ref, st_ref = reference(spatial_fea, structural_fea, neighbor_index,
                               tex_fea, params)

    assert sp_out.shape == (B, c_sp_out, N)
    assert st_out.shape == (B, c_st_out, N)
    assert jnp.allclose(sp_out, sp_ref, atol=1e-4, rtol=1e-4), "spatial mismatch"
    assert jnp.allclose(st_out, st_ref, atol=1e-4, rtol=1e-4), "structural mismatch"

    print("KERNEL_OK")
</pallas_src>

<mosaic_0001>
module attributes {stable_mosaic.version = 11 : i64} {
  func.func @mesh_conv_kernel(%arg0: i32, %arg1: i32, %arg2: memref<1x16x128xf32, #tpu.memory_space<vmem>>, %arg3: memref<1x16x128xf32, #tpu.memory_space<vmem>>, %arg4: memref<1x8x128xf32, #tpu.memory_space<vmem>>, %arg5: memref<1x3x16x128xf32, #tpu.memory_space<vmem>>, %arg6: memref<32x16xf32, #tpu.memory_space<vmem>>, %arg7: memref<32x16xf32, #tpu.memory_space<vmem>>, %arg8: memref<32x8xf32, #tpu.memory_space<vmem>>, %arg9: memref<32x1xf32, #tpu.memory_space<vmem>>, %arg10: memref<16x16xf32, #tpu.memory_space<vmem>>, %arg11: memref<16x16xf32, #tpu.memory_space<vmem>>, %arg12: memref<16x1xf32, #tpu.memory_space<vmem>>, %arg13: memref<32x16xf32, #tpu.memory_space<vmem>>, %arg14: memref<32x1xf32, #tpu.memory_space<vmem>>, %arg15: memref<1x32x128xf32, #tpu.memory_space<vmem>>, %arg16: memref<1x32x128xf32, #tpu.memory_space<vmem>>) attributes {dimension_semantics = [#tpu.dimension_semantics<parallel>, #tpu.dimension_semantics<parallel>], iteration_bounds = array<i64: 2, 2>, scalar_prefetch = 0 : i64, scratch_operands = 0 : i64, tpu.core_type = #tpu.core_type<tc>, window_params = [{transform_indices = @transform_0, window_bounds = array<i64: 1, 16, 128>}, {transform_indices = @transform_1, window_bounds = array<i64: 1, 16, 128>}, {transform_indices = @transform_2, window_bounds = array<i64: 1, 8, 128>}, {transform_indices = @transform_3, window_bounds = array<i64: 1, 3, 16, 128>}, {pipeline_mode = #tpu.pipeline_mode<synchronous>, transform_indices = @transform_4, window_bounds = array<i64: 32, 16>}, {pipeline_mode = #tpu.pipeline_mode<synchronous>, transform_indices = @transform_5, window_bounds = array<i64: 32, 16>}, {pipeline_mode = #tpu.pipeline_mode<synchronous>, transform_indices = @transform_6, window_bounds = array<i64: 32, 8>}, {pipeline_mode = #tpu.pipeline_mode<synchronous>, transform_indices = @transform_7, window_bounds = array<i64: 32, 1>}, {pipeline_mode = #tpu.pipeline_mode<synchronous>, transform_indices = @transform_8, window_bounds = array<i64: 16, 16>}, {pipeline_mode = #tpu.pipeline_mode<synchronous>, transform_indices = @transform_9, window_bounds = array<i64: 16, 16>}, {pipeline_mode = #tpu.pipeline_mode<synchronous>, transform_indices = @transform_10, window_bounds = array<i64: 16, 1>}, {pipeline_mode = #tpu.pipeline_mode<synchronous>, transform_indices = @transform_11, window_bounds = array<i64: 32, 16>}, {pipeline_mode = #tpu.pipeline_mode<synchronous>, transform_indices = @transform_12, window_bounds = array<i64: 32, 1>}, {transform_indices = @transform_13, window_bounds = array<i64: 1, 32, 128>}, {transform_indices = @transform_14, window_bounds = array<i64: 1, 32, 128>}]} {
    %c0 = arith.constant 0 : index
    %c0_0 = arith.constant 0 : index
    %c0_1 = arith.constant 0 : index
    %0 = vector.load %arg2[%c0, %c0_0, %c0_1] : memref<1x16x128xf32, #tpu.memory_space<vmem>>, vector<1x16x128xf32>
    %1 = vector.shape_cast %0 : vector<1x16x128xf32> to vector<16x128xf32>
    %c0_2 = arith.constant 0 : index
    %c0_3 = arith.constant 0 : index
    %c0_4 = arith.constant 0 : index
    %2 = vector.load %arg3[%c0_2, %c0_3, %c0_4] : memref<1x16x128xf32, #tpu.memory_space<vmem>>, vector<1x16x128xf32>
    %3 = vector.shape_cast %2 : vector<1x16x128xf32> to vector<16x128xf32>
    %c0_5 = arith.constant 0 : index
    %c0_6 = arith.constant 0 : index
    %c0_7 = arith.constant 0 : index
    %4 = vector.load %arg4[%c0_5, %c0_6, %c0_7] : memref<1x8x128xf32, #tpu.memory_space<vmem>>, vector<1x8x128xf32>
    %5 = vector.shape_cast %4 : vector<1x8x128xf32> to vector<8x128xf32>
    %c0_8 = arith.constant 0 : index
    %c0_9 = arith.constant 0 : index
    %6 = vector.load %arg6[%c0_8, %c0_9] : memref<32x16xf32, #tpu.memory_space<vmem>>, vector<32x16xf32>
    %cst = arith.constant dense<0.000000e+00> : vector<32x128xf32>
    %7 = tpu.matmul %6, %1, %cst {dimension_numbers = #tpu.dot_dimension_numbers<[1], [0], [0], [1], [0, 0, 1, 1], [], []>} : vector<32x16xf32>, vector<16x128xf32>, vector<32x128xf32> -> vector<32x128xf32>
    %c0_10 = arith.constant 0 : index
    %c0_11 = arith.constant 0 : index
    %8 = vector.load %arg7[%c0_10, %c0_11] : memref<32x16xf32, #tpu.memory_space<vmem>>, vector<32x16xf32>
    %cst_12 = arith.constant dense<0.000000e+00> : vector<32x128xf32>
    %9 = tpu.matmul %8, %3, %cst_12 {dimension_numbers = #tpu.dot_dimension_numbers<[1], [0], [0], [1], [0, 0, 1, 1], [], []>} : vector<32x16xf32>, vector<16x128xf32>, vector<32x128xf32> -> vector<32x128xf32>
    %10 = arith.addf %7, %9 : vector<32x128xf32>
    %c0_13 = arith.constant 0 : index
    %c0_14 = arith.constant 0 : index
    %11 = vector.load %arg8[%c0_13, %c0_14] : memref<32x8xf32, #tpu.memory_space<vmem>>, vector<32x8xf32>
    %cst_15 = arith.constant dense<0.000000e+00> : vector<32x128xf32>
    %12 = tpu.matmul %11, %5, %cst_15 {dimension_numbers = #tpu.dot_dimension_numbers<[1], [0], [0], [1], [0, 0, 1, 1], [], []>} : vector<32x8xf32>, vector<8x128xf32>, vector<32x128xf32> -> vector<32x128xf32>
    %13 = arith.addf %10, %12 : vector<32x128xf32>
    %c0_16 = arith.constant 0 : index
    %c0_17 = arith.constant 0 : index
    %14 = vector.load %arg9[%c0_16, %c0_17] : memref<32x1xf32, #tpu.memory_space<vmem>>, vector<32x1xf32>
    %15 = vector.broadcast %14 : vector<32x1xf32> to vector<32x128xf32>
    %16 = arith.addf %13, %15 : vector<32x128xf32>
    %cst_18 = arith.constant 0.000000e+00 : f32
    %17 = vector.broadcast %cst_18 : f32 to vector<32x128xf32>
    %18 = arith.maximumf %16, %17 : vector<32x128xf32>
    %c0_19 = arith.constant 0 : index
    %c0_20 = arith.constant 0 : index
    %c0_21 = arith.constant 0 : index
    %19 = vector.load %arg15[%c0_19, %c0_20, %c0_21] : memref<1x32x128xf32, #tpu.memory_space<vmem>>, vector<1x32x128xf32>
    %20 = vector.shape_cast %19 : vector<1x32x128xf32> to vector<32x128xf32>
    %21 = vector.shape_cast %18 : vector<32x128xf32> to vector<1x32x128xf32>
    tpu.vector_store %arg15[%c0_19, %c0_20, %c0_21], %21 {strides = array<i32>} : memref<1x32x128xf32, #tpu.memory_space<vmem>>, vector<1x32x128xf32>,
    %c0_22 = arith.constant 0 : index
    %c0_23 = arith.constant 0 : index
    %22 = vector.load %arg10[%c0_22, %c0_23] : memref<16x16xf32, #tpu.memory_space<vmem>>, vector<16x16xf32>
    %cst_24 = arith.constant dense<0.000000e+00> : vector<16x128xf32>
    %23 = tpu.matmul %22, %3, %cst_24 {dimension_numbers = #tpu.dot_dimension_numbers<[1], [0], [0], [1], [0, 0, 1, 1], [], []>} : vector<16x16xf32>, vector<16x128xf32>, vector<16x128xf32> -> vector<16x128xf32>
    %c0_25 = arith.constant 0 : index
    %c0_26 = arith.constant 0 : index
    %24 = vector.load %arg12[%c0_25, %c0_26] : memref<16x1xf32, #tpu.memory_space<vmem>>, vector<16x1xf32>
    %25 = vector.broadcast %24 : vector<16x1xf32> to vector<16x128xf32>
    %26 = arith.addf %23, %25 : vector<16x128xf32>
    %c0_27 = arith.constant 0 : index
    %c0_28 = arith.constant 0 : index
    %27 = vector.load %arg11[%c0_27, %c0_28] : memref<16x16xf32, #tpu.memory_space<vmem>>, vector<16x16xf32>
    %c0_29 = arith.constant 0 : index
    %c0_30 = arith.constant 0 : index
    %c0_31 = arith.constant 0 : index
    %c0_32 = arith.constant 0 : index
    %28 = vector.load %arg5[%c0_29, %c0_30, %c0_31, %c0_32] : memref<1x3x16x128xf32, #tpu.memory_space<vmem>>, vector<1x1x16x128xf32>
    %29 = vector.shape_cast %28 : vector<1x1x16x128xf32> to vector<16x128xf32>
    %cst_33 = arith.constant dense<0.000000e+00> : vector<16x128xf32>
    %30 = tpu.matmul %27, %29, %cst_33 {dimension_numbers = #tpu.dot_dimension_numbers<[1], [0], [0], [1], [0, 0, 1, 1], [], []>} : vector<16x16xf32>, vector<16x128xf32>, vector<16x128xf32> -> vector<16x128xf32>
    %31 = arith.addf %26, %30 : vector<16x128xf32>
    %cst_34 = arith.constant 0.000000e+00 : f32
    %32 = vector.broadcast %cst_34 : f32 to vector<16x128xf32>
    %33 = arith.maximumf %31, %32 : vector<16x128xf32>
    %c0_35 = arith.constant 0 : index
    %c0_36 = arith.constant 0 : index
    %34 = vector.load %arg11[%c0_35, %c0_36] : memref<16x16xf32, #tpu.memory_space<vmem>>, vector<16x16xf32>
    %c0_37 = arith.constant 0 : index
    %c1 = arith.constant 1 : index
    %c0_38 = arith.constant 0 : index
    %c0_39 = arith.constant 0 : index
    %35 = vector.load %arg5[%c0_37, %c1, %c0_38, %c0_39] : memref<1x3x16x128xf32, #tpu.memory_space<vmem>>, vector<1x1x16x128xf32>
    %36 = vector.shape_cast %35 : vector<1x1x16x128xf32> to vector<16x128xf32>
    %cst_40 = arith.constant dense<0.000000e+00> : vector<16x128xf32>
    %37 = tpu.matmul %34, %36, %cst_40 {dimension_numbers = #tpu.dot_dimension_numbers<[1], [0], [0], [1], [0, 0, 1, 1], [], []>} : vector<16x16xf32>, vector<16x128xf32>, vector<16x128xf32> -> vector<16x128xf32>
    %38 = arith.addf %26, %37 : vector<16x128xf32>
    %cst_41 = arith.constant 0.000000e+00 : f32
    %39 = vector.broadcast %cst_41 : f32 to vector<16x128xf32>
    %40 = arith.maximumf %38, %39 : vector<16x128xf32>
    %41 = arith.maximumf %33, %40 : vector<16x128xf32>
    %c0_42 = arith.constant 0 : index
    %c0_43 = arith.constant 0 : index
    %42 = vector.load %arg11[%c0_42, %c0_43] : memref<16x16xf32, #tpu.memory_space<vmem>>, vector<16x16xf32>
    %c0_44 = arith.constant 0 : index
    %c2 = arith.constant 2 : index
    %c0_45 = arith.constant 0 : index
    %c0_46 = arith.constant 0 : index
    %43 = vector.load %arg5[%c0_44, %c2, %c0_45, %c0_46] : memref<1x3x16x128xf32, #tpu.memory_space<vmem>>, vector<1x1x16x128xf32>
    %44 = vector.shape_cast %43 : vector<1x1x16x128xf32> to vector<16x128xf32>
    %cst_47 = arith.constant dense<0.000000e+00> : vector<16x128xf32>
    %45 = tpu.matmul %42, %44, %cst_47 {dimension_numbers = #tpu.dot_dimension_numbers<[1], [0], [0], [1], [0, 0, 1, 1], [], []>} : vector<16x16xf32>, vector<16x128xf32>, vector<16x128xf32> -> vector<16x128xf32>
    %46 = arith.addf %26, %45 : vector<16x128xf32>
    %cst_48 = arith.constant 0.000000e+00 : f32
    %47 = vector.broadcast %cst_48 : f32 to vector<16x128xf32>
    %48 = arith.maximumf %46, %47 : vector<16x128xf32>
    %49 = arith.maximumf %41, %48 : vector<16x128xf32>
    %c0_49 = arith.constant 0 : index
    %c0_50 = arith.constant 0 : index
    %50 = vector.load %arg13[%c0_49, %c0_50] : memref<32x16xf32, #tpu.memory_space<vmem>>, vector<32x16xf32>
    %cst_51 = arith.constant dense<0.000000e+00> : vector<32x128xf32>
    %51 = tpu.matmul %50, %49, %cst_51 {dimension_numbers = #tpu.dot_dimension_numbers<[1], [0], [0], [1], [0, 0, 1, 1], [], []>} : vector<32x16xf32>, vector<16x128xf32>, vector<32x128xf32> -> vector<32x128xf32>
    %c0_52 = arith.constant 0 : index
    %c0_53 = arith.constant 0 : index
    %52 = vector.load %arg14[%c0_52, %c0_53] : memref<32x1xf32, #tpu.memory_space<vmem>>, vector<32x1xf32>
    %53 = vector.broadcast %52 : vector<32x1xf32> to vector<32x128xf32>
    %54 = arith.addf %51, %53 : vector<32x128xf32>
    %cst_54 = arith.constant 0.000000e+00 : f32
    %55 = vector.broadcast %cst_54 : f32 to vector<32x128xf32>
    %56 = arith.maximumf %54, %55 : vector<32x128xf32>
    %c0_55 = arith.constant 0 : index
    %c0_56 = arith.constant 0 : index
    %c0_57 = arith.constant 0 : index
    %57 = vector.load %arg16[%c0_55, %c0_56, %c0_57] : memref<1x32x128xf32, #tpu.memory_space<vmem>>, vector<1x32x128xf32>
    %58 = vector.shape_cast %57 : vector<1x32x128xf32> to vector<32x128xf32>
    %59 = vector.shape_cast %56 : vector<32x128xf32> to vector<1x32x128xf32>
    tpu.vector_store %arg16[%c0_55, %c0_56, %c0_57], %59 {strides = array<i32>} : memref<1x32x128xf32, #tpu.memory_space<vmem>>, vector<1x32x128xf32>,
    return
  }
  func.func @transform_0(%arg0: i32, %arg1: i32) -> (i32, i32, i32) {
    %c0_i32 = arith.constant 0 : i32
    %c0_i32_0 = arith.constant 0 : i32
    return %arg0, %c0_i32, %arg1 : i32, i32, i32
  }
  func.func @transform_1(%arg0: i32, %arg1: i32) -> (i32, i32, i32) {
    %c0_i32 = arith.constant 0 : i32
    %c0_i32_0 = arith.constant 0 : i32
    return %arg0, %c0_i32, %arg1 : i32, i32, i32
  }
  func.func @transform_2(%arg0: i32, %arg1: i32) -> (i32, i32, i32) {
    %c0_i32 = arith.constant 0 : i32
    %c0_i32_0 = arith.constant 0 : i32
    return %arg0, %c0_i32, %arg1 : i32, i32, i32
  }
  func.func @transform_3(%arg0: i32, %arg1: i32) -> (i32, i32, i32, i32) {
    %c0_i32 = arith.constant 0 : i32
    %c0_i32_0 = arith.constant 0 : i32
    %c0_i32_1 = arith.constant 0 : i32
    return %arg0, %c0_i32, %c0_i32_0, %arg1 : i32, i32, i32, i32
  }
  func.func @transform_4(%arg0: i32, %arg1: i32) -> (i32, i32) {
    %c0_i32 = arith.constant 0 : i32
    %c0_i32_0 = arith.constant 0 : i32
    %c0_i32_1 = arith.constant 0 : i32
    return %c0_i32, %c0_i32_0 : i32, i32
  }
  func.func @transform_5(%arg0: i32, %arg1: i32) -> (i32, i32) {
    %c0_i32 = arith.constant 0 : i32
    %c0_i32_0 = arith.constant 0 : i32
    %c0_i32_1 = arith.constant 0 : i32
    return %c0_i32, %c0_i32_0 : i32, i32
  }
  func.func @transform_6(%arg0: i32, %arg1: i32) -> (i32, i32) {
    %c0_i32 = arith.constant 0 : i32
    %c0_i32_0 = arith.constant 0 : i32
    %c0_i32_1 = arith.constant 0 : i32
    return %c0_i32, %c0_i32_0 : i32, i32
  }
  func.func @transform_7(%arg0: i32, %arg1: i32) -> (i32, i32) {
    %c0_i32 = arith.constant 0 : i32
    %c0_i32_0 = arith.constant 0 : i32
    %c0_i32_1 = arith.constant 0 : i32
    return %c0_i32, %c0_i32_0 : i32, i32
  }
  func.func @transform_8(%arg0: i32, %arg1: i32) -> (i32, i32) {
    %c0_i32 = arith.constant 0 : i32
    %c0_i32_0 = arith.constant 0 : i32
    %c0_i32_1 = arith.constant 0 : i32
    return %c0_i32, %c0_i32_0 : i32, i32
  }
  func.func @transform_9(%arg0: i32, %arg1: i32) -> (i32, i32) {
    %c0_i32 = arith.constant 0 : i32
    %c0_i32_0 = arith.constant 0 : i32
    %c0_i32_1 = arith.constant 0 : i32
    return %c0_i32, %c0_i32_0 : i32, i32
  }
  func.func @transform_10(%arg0: i32, %arg1: i32) -> (i32, i32) {
    %c0_i32 = arith.constant 0 : i32
    %c0_i32_0 = arith.constant 0 : i32
    %c0_i32_1 = arith.constant 0 : i32
    return %c0_i32, %c0_i32_0 : i32, i32
  }
  func.func @transform_11(%arg0: i32, %arg1: i32) -> (i32, i32) {
    %c0_i32 = arith.constant 0 : i32
    %c0_i32_0 = arith.constant 0 : i32
    %c0_i32_1 = arith.constant 0 : i32
    return %c0_i32, %c0_i32_0 : i32, i32
  }
  func.func @transform_12(%arg0: i32, %arg1: i32) -> (i32, i32) {
    %c0_i32 = arith.constant 0 : i32
    %c0_i32_0 = arith.constant 0 : i32
    %c0_i32_1 = arith.constant 0 : i32
    return %c0_i32, %c0_i32_0 : i32, i32
  }
  func.func @transform_13(%arg0: i32, %arg1: i32) -> (i32, i32, i32) {
    %c0_i32 = arith.constant 0 : i32
    %c0_i32_0 = arith.constant 0 : i32
    return %arg0, %c0_i32, %arg1 : i32, i32, i32
  }
  func.func @transform_14(%arg0: i32, %arg1: i32) -> (i32, i32, i32) {
    %c0_i32 = arith.constant 0 : i32
    %c0_i32_0 = arith.constant 0 : i32
    return %arg0, %c0_i32, %arg1 : i32, i32, i32
  }
}

</mosaic_0001>

<bundles_post_ra>
// kernel: tpu_custom_call.1
= control target key start
LH: loop header
LB: loop body
LE: loop exit
PB: predicated region body
PF: predicated region fallthrough
CT: control target
= control target key end

     0   :  { %s2838_s0 = inlined_call_operand.vmem [shape: f32[2,16,256], index: 0, kind: input, shape index: {}]   ;;  %s2839_s1 = inlined_call_operand.hbm [shape: f32[2,16,256], index: 1, kind: input, shape index: {}]   ;;  %s2840_s2 = inlined_call_operand.hbm [shape: f32[2,8,256], index: 2, kind: input, shape index: {}]   ;;  %s2841_s3 = inlined_call_operand.vmem [shape: f32[2,3,16,256], index: 3, kind: input, shape index: {}]   ;;  %s2842_s4 = inlined_call_operand.vmem [shape: f32[32,16], index: 4, kind: input, shape index: {}]   ;;  %s2843_s5 = inlined_call_operand.vmem [shape: f32[32,16], index: 5, kind: input, shape index: {}]   ;;  %s2844_s6 = inlined_call_operand.vmem [shape: f32[32,8], index: 6, kind: input, shape index: {}]   ;;  %s2845_s7 = inlined_call_operand.vmem [shape: f32[32,1], index: 7, kind: input, shape index: {}]   ;;  %s2846_s8 = inlined_call_operand.hbm [shape: f32[16,16], index: 8, kind: input, shape index: {}]   ;;  %s2847_s9 = inlined_call_operand.hbm [shape: f32[16,16], index: 9, kind: input, shape index: {}]   ;;  %s2848_s10 = inlined_call_operand.vmem [shape: f32[16,1], index: 10, kind: input, shape index: {}]   ;;  %s2849_s11 = inlined_call_operand.vmem [shape: f32[32,16], index: 11, kind: input, shape index: {}]   ;;  %s2850_s12 = inlined_call_operand.vmem [shape: f32[32,1], index: 12, kind: input, shape index: {}]   ;;  %s2851_s13 = inlined_call_operand.hbm [shape: f32[2,32,256], index: 13, kind: output, shape index: {0}]   ;;  %s2852_s14 = inlined_call_operand.hbm [shape: f32[2,32,256], index: 14, kind: output, shape index: {1}]  }
   0x1   :  { %2874 = sst [smem:[#allocation31_spill]] %s2838_s0 }
   0x2   :  { %2875 = sst [smem:[#allocation32_spill]] %s2839_s1 }
   0x3   :  { %2876 = sst [smem:[#allocation33_spill]] %s2842_s4 }
   0x4   :  { %2877 = sst [smem:[#allocation34_spill]] %s2844_s6 }
   0x5   :  { %2878 = sst [smem:[#allocation35_spill]] %s2845_s7 }
   0x6   :  { %2879 = sst [smem:[#allocation36_spill]] %s2846_s8 }
   0x7   :  { %2880 = sst [smem:[#allocation37_spill]] %s2847_s9 }
   0x8   :  { %2881 = sst [smem:[#allocation38_spill]] %s2848_s10 }
   0x9   :  { %2882 = sst [smem:[#allocation39_spill]] %s2849_s11 }
   0xa   :  { %2883 = sst [smem:[#allocation40_spill]] %s2850_s12 }
   0xb   :  { %2884 = sst [smem:[#allocation41_spill]] %s2851_s13 }
   0xc   :  { %2885 = sst [smem:[#allocation42_spill]] %s2852_s14 }
   0xd   :  { %20 = vsyncpa [#allocation4], 0 }
   0xe   :  { %22 = vsyncpa [#allocation4 + $0x1], 0 }
   0xf   :  { %23 = vsyncpa [#allocation7], 0 }
  0x10   :  { %25 = vsyncpa [#allocation7 + $0x1], 0 }
  0x11   :  { %26 = vsyncpa [#allocation11], 0 }
  0x12   :  { %27 = vsyncpa [#allocation5], 0 }
  0x13   :  { %29 = vsyncpa [#allocation5 + $0x1], 0 }
  0x14   :  { %30 = vsyncpa [#allocation14], 0 }
  0x15   :  { %32 = vsyncpa [#allocation14 + $0x1], 0  ;;  %s2424_s29 = smov 0   ;;  %s2426_s30 = smov 0  }
  0x16   :  { %s2428_s15 = smov 0   ;;  %s2430_s16 = smov 0  }
  0x17   :  { %s2432_s17 = smov 0   ;;  %s2434_s18 = smov 0  }
  0x18   :  { %s2436_s19 = smov 0   ;;  %s2438_s20 = smov 0  }
  0x19 LB: > { %2886 = sst [smem:[#allocation21_spill]] %s2304_s29  ;;  %s2465_s21 = sadd.s32 4294967295, %s2332_s20   ;;  %s2332_s20 = sphi %s2438_s20, %s38_s20   ;;  %s2328_s19 = sphi %s2436_s19, %s2939_s19   ;;  %s2324_s18 = sphi %s2434_s18, %s2938_s18   ;;  %s2320_s17 = sphi %s2432_s17, %s2937_s17   ;;  %s2316_s16 = sphi %s2430_s16, %s2936_s16   ;;  %s2312_s15 = sphi %s2428_s15, %s2931_s15   ;;  %s2308_s30 = sphi %s2426_s30, %s2935_s30   ;;  %s2304_s29 = sphi %s2424_s29, %s2934_s29  }
  0x1a   : > { %2887 = sst [smem:[#allocation22_spill]] %s2312_s15  ;;  %s1807_s22 = sadd.s32 4294967294, %s2332_s20  }
  0x1b   : > { %2888 = sst [smem:[#allocation23_spill]] %s2316_s16  ;;  %s47_s23 = sadd.s32 1, %s2324_s18 }
  0x1c   : > { %2889 = sst [smem:[#allocation24_spill]] %s2320_s17  ;;  %s50_s24 = sadd.s32 1, %s2328_s19 }
  0x1d   : > { %2890 = sst [smem:[#allocation25_spill]] %s2332_s20  ;;  %p48_p0 = scmp.ge.s32.totalorder %s47_s23, 2 }
  0x1e   : > { %s59_s25 = sadd.s32 1, %s2312_s15  ;;  %p66_p1 = scmp.ne.s32.totalorder %s2312_s15, %s2308_s30 }
  0x1f   : > { %p67_p2 = scmp.eq.s32.totalorder %s2332_s20, 0  ;;  %s2941_s23 = smov (%p48_p0, %s47_s23), 0 }
  0x20   : > { %2891 = sst [smem:[#allocation26_spill]] %s2941_s23  ;;  %s2943_s24 = smov (!%p48_p0, %s50_s24), %s2328_s19 }
  0x21   : > { %s55_s26 = ssub.s32 %s2324_s18, %s2941_s23  ;;  %p2479_p3 = por %p67_p2, %p66_p1 }
  0x22   : > { %p52_p4 = scmp.ge.s32.totalorder %s2943_s24, 2  ;;  %p100_p5 = scmp.ne.s32.totalorder %s2308_s30, %s2304_s29 }
  0x23   : > { %p2860_p6 = scmp.eq.s32.totalorder %s2465_s21, 0  ;;  %p371_p7 = scmp.eq.s32.totalorder %s2465_s21, 3 }
  0x24   : > { %s2945_s24 = smov (%p52_p4, %s2943_s24), 0  ;;  %p377_p10 = scmp.eq.s32.totalorder %s1807_s22, 3 }
  0x25   : > { %2893 = sst [smem:[#allocation27_spill]] %s2945_s24  ;;  %p2491_p8 = por %p2860_p6, %p100_p5 }
  0x26   : > { %p2495_p9 = por %p371_p7, %p66_p1  ;;  %s54_s14 = ssub.s32 %s2328_s19, %s2945_s24 }
  0x27   : > { %s2894_s28 = scalar_select %p2491_p8, 1, 0 }
  0x28   : > { %s2895_s23 = scalar_select %p2495_p9, 1, 0 }
  0x29   : > { %s56_s13 = sor.u32 %s55_s26, %s54_s14  ;;  %p1808_p11 = scmp.ge.s32.totalorder %s2332_s20, 1 }
  0x2a   : > { %2896 = sst [smem:[#allocation28_spill]] %s2895_s23  ;;  %p57_p12 = scmp.eq.s32.totalorder %s56_s13, 0 }
  0x2b   : > { %p2502_p13 = por %p377_p10, %p100_p5  ;;  %p412_p0 = scmp.lt.s32.totalorder %s2332_s20, 5 }
  0x2c   : > { %s2508_s16 = scalar_select %p57_p12, %s2312_s15, %s59_s25  }
  0x2d   : > { %s2897_s29 = scalar_select %p2502_p13, 1, 0 }
  0x2e   : > { %2899 = sst [smem:[#allocation30_spill]] %s2508_s16  ;;  %p2510_p2 = pnand %p1808_p11, %p412_p0 }
  0x2f   : > { %2898 = sst [smem:[#allocation29_spill]] %s2897_s29  ;;  %s2334_s11 = smov [#allocation9]  }
  0x30   : > { %s436_s12 = sshll.u32 %s2334_s11, 4  ;;  %p1994_p1 = pneg %p2510_p2  ;;  %s437_s12 = int_to_ptr.vmem [resolvable:$true] %s436_s12 }
  0x31   : > { %s2335_s14 = smov [#allocation10]   ;;  %s2101_s25 = scalar_lea.vmem %s437_s12, 256 }
  0x32   : > { %p2518_p4 = pnand %p1994_p1, %p2860_p6  ;;  %s449_s22 = sshll.u32 %s2335_s14, 4  ;;  %s450_s22 = int_to_ptr.vmem [resolvable:$true] %s449_s22 }
  0x33   : > { %p2102_p7 = scmp.ne.s32.totalorder %s437_s12, %s2101_s25  ;;  %p2109_p12 = scmp.lt.s32.totalorder %s437_s12, %s437_s12 }
  0x34   : > { %p2092_p5 = pneg %p2518_p4  ;;  %p2110_p0 = scmp.lt.s32.totalorder %s2101_s25, %s2101_s25 }
  0x36   : > { %p2104_p10 = pnand %p2102_p7, %p2092_p5  ;;  %p2111_p13 = por %p2110_p0, %p2109_p12 }
  0x38   : > { %p2105_p11 = pneg %p2104_p10 }
  0x3a   : > { %p2112_p1 = pnand %p2111_p13, %p2105_p11 }
  0x3c   : > { %2115 = shalt.err (!%p2112_p1)
}
  0x3d   : > { %s2336_s11 = smov 128   ;;  %s2337_s26 = smov 8  }
  0x3e   : > { %s2902_s8 = sld [smem:[#allocation36_spill]]  ;;  %s2127_s16 = scalar_lea.vmem %s450_s22, 256 }
  0x3f   : > { %p2128_p6 = scmp.ne.s32.totalorder %s450_s22, %s2127_s16  ;;  %p2135_p9 = scmp.lt.s32.totalorder %s450_s22, %s450_s22 }
  0x40   : > { %p2136_p8 = scmp.lt.s32.totalorder %s2127_s16, %s2127_s16 }
  0x41   : > { %p2130_p7 = pnand %p2128_p6, %p2092_p5 }
  0x42   : > { %p2137_p12 = por %p2136_p8, %p2135_p9 }
  0x43   : > { %p2131_p10 = pneg %p2130_p7 }
  0x44   : > { %1997 = dma.hbm_to_vmem [thread:$0]  (!%p2518_p4), %s2902_s8, 256, %s437_s12, [#allocation7], %s2336_s11, %s2336_s11, %s2337_s26  }
  0x45   : > { %p2138_p13 = pnand %p2137_p12, %p2131_p10 }
  0x47   : > { %2141 = shalt.err (!%p2138_p13)
}
  0x48   : > { %s2903_s9 = sld [smem:[#allocation37_spill]]  ;;  %p1811_p11 = scmp.ge.s32.totalorder %s2332_s20, 4 }
  0x4a   : > { %468 = sbr.rel (%p1811_p11) target bundleno = 134 (0x86), region = 52 }
  0x4e   : > { %2000 = dma.hbm_to_vmem [thread:$0]  (!%p2518_p4), %s2903_s9, 256, %s450_s22, [#allocation11], %s2336_s11, %s2336_s11, %s2337_s26  }
  0x4f   : > { %471 = sbr.rel (!%p2479_p3) target bundleno = 90 (0x5a), region = 56  ;;  %s473_s12 = sand.u32 (%p2479_p3), 1, %s2312_s15  }
  0x50   : > { %s1813_s16 = sshll.u32 (%p2479_p3), %s2328_s19, 2  ;;  %s1812_s24 = sshll.u32 (%p2479_p3), %s473_s12, 4 }
  0x51   : > { %s477_s14 = sadd.s32 (%p2479_p3), %s2324_s18, %s1813_s16  ;;  %s2904_s0 = sld [smem:[#allocation31_spill]] (%p2479_p3) }
  0x52   : > { %s1814_s8 = sshll.u32 (%p2479_p3), %s477_s14, 3  ;;  %s475_s29 = scalar_lea.vmem (%p2479_p3), [#allocation2], %s1812_s24 }
  0x57   : > { %s479_s7 = scalar_lea.vmem %s2904_s0, %s1814_s8 }
  0x58   : > { %v510_v0 = vld [vmem:[%s479_s7] sm:$0xff]  ;;  %v512_v1 = vld [vmem:[%s479_s7 + $0x10] sm:$0xff] }
  0x59   : > { %511 = vst [vmem:[%s475_s29] sm:$0xff] %v510_v0  ;;  %513 = vst [vmem:[%s475_s29 + $0x8] sm:$0xff] %v512_v1 }
  0x5a PF: > { %s2550_s22 = sand.u32 1, %s2312_s15   ;;  %s1816_s11 = sshll.u32 %s2328_s19, 2 }
  0x5b   : > { %s1815_s26 = sshll.u32 %s2550_s22, 4  ;;  %s529_s25 = sadd.s32 %s2324_s18, %s1816_s11 }
  0x5c   : > { %s1817_s23 = sshll.u32 %s529_s25, 7  ;;  %s524_s8 = scalar_lea.vmem [#allocation3], %s1815_s26 }
  0x5d   : > { %s532_s12 = sshll.u32 %s524_s8, 4  ;;  %s2905_s1 = sld [smem:[#allocation32_spill]]  ;;  %s533_s12 = int_to_ptr.vmem [resolvable:$true] %s532_s12 }
  0x5e   : > { %s542_s14 = sand.u32 1, %s2332_s20   ;;  %s521_s13 = scalar_lea.sflag [#allocation4], %s2550_s22 }
  0x5f   : > { %s2154_s29 = scalar_lea.vmem %s533_s12, 256  ;;  %s2338_s0 = smov [#allocation3]  }
  0x60   : > { %p2155_p6 = scmp.ne.s32.totalorder %s533_s12, %s2154_s29  ;;  %s2158_s9 = sshll.u32 %s2338_s0, 4  ;;  %s2159_s9 = int_to_ptr.vmem [resolvable:$false] %s2158_s9 }
  0x61   : > { %s2160_s15 = scalar_lea.vmem %s2159_s9, 512  ;;  %p2161_p4 = scmp.lt.s32.totalorder %s533_s12, %s2159_s9 }
  0x62   : > { %p2156_p8 = pnand %p2155_p6, %p2479_p3  ;;  %p2162_p5 = scmp.lt.s32.totalorder %s2160_s15, %s2154_s29 }
  0x63   : > { %s531_s24 = scalar_lea.hbm %s2905_s1, %s1817_s23 }
  0x64   : > { %p2157_p9 = pneg %p2156_p8  ;;  %p2163_p0 = por %p2162_p5, %p2161_p4 }
  0x66   : > { %p2164_p1 = pnand %p2163_p0, %p2157_p9 }
  0x68   : > { %2167 = shalt.err (!%p2164_p1)
}
  0x69   : > { %s2339_s11 = smov 256   ;;  %s2340_s26 = smov 128  }
  0x6a   : > { %s2341_s25 = smov 8   ;;  %s1818_s23 = sshll.u32 %s2550_s22, 3 }
  0x6b   : > { %1982 = dma.hbm_to_vmem [thread:$0]  (%p2479_p3), %s531_s24, 256, %s533_s12, %s521_s13, %s2339_s11, %s2340_s26, %s2341_s25  }
  0x6c   : > { %s1819_s8 = sshll.u32 %s2328_s19, 1  ;;  %s546_s7 = scalar_lea.vmem [#allocation6], %s1818_s23 }
  0x6d   : > { %s551_s0 = sadd.s32 %s2324_s18, %s1819_s8  ;;  %s555_s16 = sshll.u32 %s546_s7, 4  ;;  %s556_s16 = int_to_ptr.vmem [resolvable:$true] %s555_s16 }
  0x6e   : > { %s1820_s9 = sshll.u32 %s551_s0, 7  ;;  %s543_s20 = scalar_lea.sflag [#allocation7], %s542_s14 }
  0x6f   : > { %s553_s1 = scalar_lea.hbm %s2840_s2, %s1820_s9  ;;  %s2180_s10 = scalar_lea.vmem %s556_s16, 128 }
  0x70   : > { %p2181_p7 = scmp.ne.s32.totalorder %s556_s16, %s2180_s10  ;;  %s2342_s6 = smov [#allocation6]  }
  0x71   : > { %s2184_s4 = sshll.u32 %s2342_s6, 4  ;;  %s2185_s4 = int_to_ptr.vmem [resolvable:$false] %s2184_s4 }
  0x72   : > { %p2182_p10 = pnand %p2181_p7, %p2479_p3  ;;  %s2186_s12 = scalar_lea.vmem %s2185_s4, 256 }
  0x73   : > { %p2187_p13 = scmp.lt.s32.totalorder %s556_s16, %s2185_s4  ;;  %p2188_p11 = scmp.lt.s32.totalorder %s2186_s12, %s2180_s10 }
  0x74   : > { %p2183_p12 = pneg %p2182_p10 }
  0x75   : > { %p2189_p6 = por %p2188_p11, %p2187_p13 }
  0x77   : > { %p2190_p8 = pnand %p2189_p6, %p2183_p12 }
  0x79   : > { %2193 = shalt.err (!%p2190_p8)
}
  0x7a   : > { %1983 = dma.hbm_to_vmem [thread:$0]  (%p2479_p3), %s553_s1, 128, %s556_s16, %s543_s20  }
  0x7b   : > { %561 = sbr.rel (!%p2479_p3) target bundleno = 134 (0x86), region = 102 }
  0x7c   : > { %s1975_s24 = smul.u32 (%p2479_p3), 48, %s2550_s22 }
  0x7d   : > { %s1976_s14 = smul.u32 (%p2479_p3), 12, %s2328_s19 }
  0x7e   : > { %s565_s10 = scalar_lea.vmem (%p2479_p3), [#allocation8], %s1975_s24 }
  0x7f   : > { %s567_s13 = sadd.s32 (%p2479_p3), %s2324_s18, %s1976_s14 }
  0x80   : > { %s1821_s6 = sshll.u32 %s567_s13, 3 }
  0x81   : > { %s569_s4 = scalar_lea.vmem %s2841_s3, %s1821_s6 }
  0x82   : > { %v608_v2 = vld [vmem:[%s569_s4] sm:$0xff]  ;;  %v610_v3 = vld [vmem:[%s569_s4 + $0x10] sm:$0xff] }
  0x83   : > { %v612_v4 = vld [vmem:[%s569_s4 + $0x20] sm:$0xff]  ;;  %609 = vst [vmem:[%s565_s10] sm:$0xff] %v608_v2  ;;  %611 = vst [vmem:[%s565_s10 + $0x8] sm:$0xff] %v610_v3  ;;  %v614_v5 = vld [vmem:[%s569_s4 + $0x30] sm:$0xff] }
  0x84   : > { %613 = vst [vmem:[%s565_s10 + $0x10] sm:$0xff] %v612_v4  ;;  %v616_v6 = vld [vmem:[%s569_s4 + $0x40] sm:$0xff]  ;;  %v618_v7 = vld [vmem:[%s569_s4 + $0x50] sm:$0xff]  ;;  %615 = vst [vmem:[%s565_s10 + $0x18] sm:$0xff] %v614_v5 }
  0x85   : > { %617 = vst [vmem:[%s565_s10 + $0x20] sm:$0xff] %v616_v6  ;;  %619 = vst [vmem:[%s565_s10 + $0x28] sm:$0xff] %v618_v7 }
  0x86 PF: > { %628 = sbr.rel (%p2510_p2) target bundleno = 598 (0x256), region = 140  ;;  %s2585_s1 = sand.u32 (!%p2510_p2), 1, %s2308_s30  }
  0x87   : > { %s1823_s20 = sshll.u32 (!%p2510_p2), %s2585_s1, 4  ;;  %s638_s22 = scalar_lea.sflag (!%p2510_p2), [#allocation4], %s2585_s1 }
  0x88   : > { %s2588_s27 = scalar_lea.vmem (!%p2510_p2), [#allocation2], %s1823_s20  ;;  %s641_s25 = scalar_lea.vmem (!%p2510_p2), [#allocation3], %s1823_s20 }
  0x89   : > { %p2906_p3 = scmp.ne.s32.totalorder (!%p2510_p2), %s2894_s28, 0 }
  0x8b   : > { %2279 = dma.done.wait (%p2906_p3), %s638_s22, 256  }
  0x8c   : > { %2281 = vsyncadd (%p2906_p3), %s638_s22, 4294967040  ;;  %s646_s17 = sand.u32 1, %s2465_s21   ;;  %s1825_s23 = sshll.u32 %s2585_s1, 3 }
  0x8d   : > { %s647_s8 = scalar_lea.sflag [#allocation7], %s646_s17  ;;  %s2597_s0 = scalar_lea.vmem [#allocation6], %s1825_s23 }
  0x8e   : > { %2283 = dma.done.wait (%p2906_p3), %s647_s8, 128  }
  0x8f   : > { %2285 = vsyncadd (%p2906_p3), %s647_s8, 4294967168  ;;  %s1977_s7 = smul.u32 48, %s2585_s1  ;;  %p2907_p2 = scmp.eq.s32.totalorder %s2465_s21, 0 }
  0x91   : > { %s2604_s16 = scalar_lea.vmem [#allocation8], %s1977_s7 }
  0x92   : > { %2287 = dma.done.wait (%p2907_p2), [#allocation7], 256   ;;  %p2908_p9 = pmov %p2907_p2 }
  0x93   : > { %p2909_p4 = pmov %p2907_p2 }
  0x94   : > { %2289 = vsyncadd (%p2908_p9), [#allocation7], 4294967040 }
  0x95   : > { %2291 = dma.done.wait (%p2909_p4), [#allocation11], 256   ;;  %p2910_p5 = pmov %p2907_p2 }
  0x96   : > { %v2343_v8 = vmov 0   ;;  %v731_v9 = vld [vmem:[%s641_s25 + $0x8] sm:$0xff]  ;;  %v730_v10 = vld [vmem:[%s641_s25] sm:$0xff]  ;;  %vm741_vm0 = vcmask 130048   ;;  %s2911_s11 = sld [smem:[#allocation33_spill]]  ;;  %vm940_vm1 = vcmask 64512  }
  0x97   : > { %2293 = vsyncadd (%p2910_p5), [#allocation11], 4294967040  ;;  %2088 = vset.pattern.permute.xlu0 %v2343_v8  ;;  %2089 = vset.pattern.permute.xlu1 %v2343_v8  ;;  %v739_v11 = vld [vmem:[%s2843_s5 + $0x10] sm:$0xff]  ;;  %v740_v12 = vld [vmem:[%s2843_s5 + $0x18] sm:$0xff]  ;;  %s2913_s12 = sld [smem:[#allocation38_spill]]  ;;  %s1828_s26 = sshll.u32 %s2585_s1, 5 }
  0x98   : > { %1971 = vmatprep.subr.mxu1 %v731_v9  ;;  %1905 = vmatprep.subr.mxu0 %v731_v9  ;;  %v729_v13 = vld [vmem:[%s2588_s27 + $0x8] sm:$0xff]  ;;  %v737_v14 = vld [vmem:[%s2843_s5] sm:$0xff]  ;;  %v1078_v27 = vld [vmem:[#allocation9] sm:$0xff]  ;;  %s2914_s13 = sld [smem:[#allocation35_spill]]  ;;  %s2716_s4 = scalar_lea.vmem [#allocation12], %s1828_s26 }
  0x99   : > { %1973 = vmatpush3.msra.mxu1 %v731_v9  ;;  %1906 = vmatpush3.msra.mxu0 %v731_v9  ;;  %v738_v15 = vld [vmem:[%s2843_s5 + $0x8] sm:$0xff]  ;;  %v728_v16 = vld [vmem:[%s2588_s27] sm:$0xff]  ;;  %s2912_s27 = sld [smem:[#allocation34_spill]]  ;;  %v1079_v29 = vld [vmem:[#allocation9 + $0x8] sm:$0xff]  ;;  %s1583_s28 = sshll.u32 %s2716_s4, 4  ;;  %s2739_s28 = int_to_ptr.vmem [resolvable:$true] %s1583_s28 }
  0x9a   : > { %1972 = vmatprep.subr.mxu1 %v730_v10  ;;  %1912 = vmatprep.mubr.msk.f32.mxu1 %vm741_vm0, %v739_v11  ;;  %v732_v18 = vld [vmem:[%s2597_s0] sm:$0xff]  ;;  %v1847_v25 = vld [vmem:[%s2604_s16 + $0x18] sm:$0xff]  ;;  %v1175_v32 = vld [vmem:[%s2604_s16] sm:$0xff]  ;;  %s2915_s8 = sld [smem:[#allocation40_spill]]  ;;  %s1564_s22 = scalar_lea.sflag [#allocation5], %s2585_s1 }
  0x9b   : > { %1974 = vmatpush3.msra.mxu1 %v730_v10  ;;  %1907 = vmatprep.subr.mxu0 %v730_v10  ;;  %v1176_v28 = vld [vmem:[%s2604_s16 + $0x8] sm:$0xff]  ;;  %v1846_v30 = vld [vmem:[%s2604_s16 + $0x10] sm:$0xff]  ;;  %v1850_v36 = vld [vmem:[%s2604_s16 + $0x20] sm:$0xff]  ;;  %s2916_s15 = sld [smem:[#allocation39_spill]]  ;;  %s2194_s25 = scalar_lea.vmem %s2739_s28, 512 }
  0x9c   : > { %1913 = vmatmul.mubr.msk.f32.vlgmr.msra.gmra.mxu1 %vm741_vm0, %v740_v12  ;;  %1915 = vmatprep.subr.mxu1 %v729_v13  ;;  %v733_v17 = vld [vmem:[%s2911_s11] sm:$0xff]  ;;  %v734_v19 = vld [vmem:[%s2911_s11 + $0x8] sm:$0xff]  ;;  %v735_v22 = vld [vmem:[%s2911_s11 + $0x10] sm:$0xff]  ;;  %s2918_s10 = sld [smem:[#allocation24_spill]]  ;;  %p2195_p0 = scmp.ne.s32.totalorder %s2739_s28, %s2194_s25 }
  0x9d   : > { %1908 = vmatpush3.msra.mxu0 %v730_v10  ;;  %1909 = vmatprep.mubr.msk.f32.mxu0 %vm741_vm0, %v737_v14  ;;  %v736_v23 = vld [vmem:[%s2911_s11 + $0x18] sm:$0xff]  ;;  %v1173_v31 = vld [vmem:[#allocation10] sm:$0xff]  ;;  %v1174_v33 = vld [vmem:[#allocation10 + $0x8] sm:$0xff]  ;;  %s2920_s23 = sld [smem:[#allocation28_spill]] }
  0x9e   : > { %1916 = vmatpush3.msra.mxu1 %v729_v13  ;;  %1910 = vmatmul.mubr.msk.f32.vlgmr.msra.gmra.mxu0 %vm741_vm0, %v738_v15  ;;  %v1851_v34 = vld [vmem:[%s2604_s16 + $0x28] sm:$0xff]  ;;  %v1042_v37 = vld [vmem:[%s2914_s13] sm:$0xff]  ;;  %v1044_v40 = vld [vmem:[%s2914_s13 + $0x10] sm:$0xff]  ;;  %s2919_s16 = sld [smem:[#allocation23_spill]] }
  0x9f   : > { %1917 = vmatprep.subr.mxu1 %v728_v16  ;;  %1919 = vmatprep.mubr.msk.f32.mxu1 %vm741_vm0, %v733_v17  ;;  %v936_v20 = vld [vmem:[%s2912_s27] sm:$0xff]  ;;  %v937_v21 = vld [vmem:[%s2912_s27 + $0x8] sm:$0xff]  ;;  %v938_v24 = vld [vmem:[%s2912_s27 + $0x10] sm:$0xff]  ;;  %s2921_s6 = sld [smem:[#allocation41_spill]] }
  0xa0   : > { %1918 = vmatpush3.msra.mxu1 %v728_v16  ;;  %1925 = vmatprep.subr.mxu0 %v732_v18  ;;  %v939_v26 = vld [vmem:[%s2912_s27 + $0x18] sm:$0xff]  ;;  %v1081_v35 = vld [vmem:[%s2913_s12 + $0x8] sm:$0xff]  ;;  %v1080_v38 = vld [vmem:[%s2913_s12] sm:$0xff] }
  0xa1   : > { %1920 = vmatmul.mubr.msk.f32.vlgmr.msra.gmra.mxu1 %vm741_vm0, %v734_v19  ;;  %1933 = vmatprep.subr.mxu1 %v731_v9  ;;  %v1043_v39 = vld [vmem:[%s2914_s13 + $0x8] sm:$0xff]  ;;  %v1045_v41 = vld [vmem:[%s2914_s13 + $0x18] sm:$0xff]  ;;  %v1434_v42 = vld [vmem:[%s2915_s8] sm:$0xff]  ;;  %s2917_s21 = smov %s2916_s15 }
  0xa2   : > { %1926 = vmatpush3.msra.mxu0 %v732_v18  ;;  %1927 = vmatprep.mubr.msk.f32.mxu0 %vm940_vm1, %v936_v20  ;;  %v1436_v43 = vld [vmem:[%s2915_s8 + $0x10] sm:$0xff]  ;;  %v1430_v44 = vld [vmem:[%s2916_s15] sm:$0xff]  ;;  %v1435_v45 = vld [vmem:[%s2915_s8 + $0x8] sm:$0xff]  ;;  %s1860_s9 = sshll.u32 %s2918_s10, 3 }
  0xa3   : > { %1934 = vmatpush3.msra.mxu1 %v731_v9  ;;  %1928 = vmatmul.mubr.msk.f32.vlgmr.msra.gmra.mxu0 %vm940_vm1, %v937_v21  ;;  %v1437_v46 = vld [vmem:[%s2915_s8 + $0x18] sm:$0xff]  ;;  %p2922_p1 = scmp.ne.s32.totalorder %s2920_s23, 0 }
  0xa4   : > { %1922 = vmatprep.mubr.msk.f32.mxu1 %vm741_vm0, %v735_v22  ;;  %1935 = vmatprep.subr.mxu1 %v730_v10  ;;  %s2737_s15 = sadd.s32 %s2919_s16, %s1860_s9 }
  0xa5   : > { %1923 = vmatmul.mubr.msk.f32.gmra.mxu1 %vm741_vm0, %v736_v23  ;;  %1930 = vmatprep.mubr.msk.f32.mxu0 %vm940_vm1, %v938_v24  ;;  %s1861_s29 = sshll.u32 %s2737_s15, 7  ;;  %p2196_p7 = pnand %p2195_p0, %p2922_p1 }
  0xa6   : > { %1936 = vmatpush3.msra.mxu1 %v730_v10  ;;  %1947 = vmatprep.subr.mxu0 %v1847_v25  ;;  %s2747_s20 = scalar_lea.hbm %s2921_s6, %s1861_s29 }
  0xa7   : > { %1931 = vmatmul.mubr.msk.f32.gmra.mxu0 %vm940_vm1, %v939_v26  ;;  %1937 = vmatprep.mubr.msk.f32.mxu1 %vm741_vm0, %v1078_v27  ;;  %p2197_p10 = pneg %p2196_p7 }
  0xa8   : > { %1948 = vmatpush3.msra.mxu0 %v1847_v25  ;;  %1940 = vmatprep.subr.mxu1 %v1176_v28 }
  0xa9   : > { %1938 = vmatmul.mubr.msk.f32.vlgmr.msra.gmra.mxu1 %vm741_vm0, %v1079_v29  ;;  %1949 = vmatprep.subr.mxu0 %v1846_v30 }
  0xaa   : > { %1941 = vmatpush3.msra.mxu1 %v1176_v28  ;;  %1950 = vmatpush3.msra.mxu0 %v1846_v30 }
  0xab   : > { %1951 = vmatprep.mubr.msk.f32.mxu0 %vm741_vm0, %v1173_v31  ;;  %1942 = vmatprep.subr.mxu1 %v1175_v32 }
  0xac   : > { %1952 = vmatmul.mubr.msk.f32.vlgmr.msra.gmra.mxu0 %vm741_vm0, %v1174_v33  ;;  %1943 = vmatpush3.msra.mxu1 %v1175_v32 }
  0xad   : > { %1944 = vmatprep.mubr.msk.f32.mxu1 %vm741_vm0, %v1173_v31  ;;  %1954 = vmatprep.subr.mxu1 %v1851_v34 }
  0xae   : > { %1945 = vmatmul.mubr.msk.f32.vlgmr.msra.gmra.mxu1 %vm741_vm0, %v1174_v33  ;;  %1089 = vperm.xlu0 %2088, %v1081_v35  }
  0xaf   : > { %1955 = vmatpush3.msra.mxu1 %v1851_v34  ;;  %1958 = vmatprep.mubr.msk.f32.mxu1 %vm741_vm0, %v1173_v31 }
  0xb0   : > { %1956 = vmatprep.subr.mxu1 %v1850_v36  ;;  %1048 = vperm.xlu1 %2089, %v1042_v37  }
  0xb1   : > { %1957 = vmatpush3.msra.mxu1 %v1850_v36  ;;  %1965 = vmatprep.mubr.msk.f32.mxu0 %vm741_vm0, %v1430_v44  ;;  %v1432_v44 = vld [vmem:[%s2917_s21 + $0x10] sm:$0xff] }
  0xb2   : > { %1959 = vmatmul.mubr.msk.f32.vlgmr.msra.gmra.mxu1 %vm741_vm0, %v1174_v33  ;;  %1084 = vperm.xlu0 %2088, %v1080_v38  }
  0xb4   : > { %1053 = vperm.xlu1 %2089, %v1043_v39  }
  0xb6   : > { %1058 = vperm.xlu0 %2088, %v1044_v40  }
  0xb8   : > { %1063 = vperm.xlu1 %2089, %v1045_v41  }
  0xba   : > { %1440 = vperm.xlu0 %2088, %v1434_v42  }
  0xbc   : > { %1445 = vperm.xlu1 %2089, %v1435_v45   ;;  %v1433_v45 = vld [vmem:[%s2917_s21 + $0x18] sm:$0xff] }
  0xbe   : > { %1450 = vperm.xlu0 %2088, %v1436_v43   ;;  %v1431_v43 = vld [vmem:[%s2917_s21 + $0x8] sm:$0xff] }
  0xc0   : > { %1455 = vperm.xlu1 %2089, %v1437_v46  }
 0x129   : > { %v1090_v49 = vpop.permute.xlu0 %1089 }
 0x12b   : > { %v1049_v47 = vpop.permute.xlu1 %1048 }
 0x12d   : > { %v1085_v58 = vpop.permute.xlu0 %1084 }
 0x12f   : > { %v1054_v53 = vpop.permute.xlu1 %1053 }
 0x131   : > { %v1059_v14 = vpop.permute.xlu0 %1058 }
 0x133   : > { %v1064_v2 = vpop.permute.xlu1 %1063 }
 0x15c   : > { %v1914_v48 = vpop.f32.mrf.mxu1 }
 0x15e   : > { %v1911_v50 = vpop.f32.mrf.mxu0  ;;  %v830_v51 = vpop.f32.mrf.mxu1 }
 0x160   : > { %v820_v52 = vpop.f32.mrf.mxu0 }
 0x161   : > { %v1921_v54 = vpop.f32.mrf.mxu1 }
 0x162   : > { %v923_v55 = vadd.f32 %v1921_v54, %v1911_v50 }
 0x163   : > { %v917_v56 = vpop.f32.mrf.mxu1  ;;  %v1929_v57 = vpop.f32.mrf.mxu0 }
 0x164   : > { %v918_v59 = vadd.f32 %v917_v56, %v820_v52  ;;  %v1039_v60 = vadd.f32 %v1929_v57, %v923_v55 }
 0x165   : > { %v1924_v61 = vpop.f32.mrf.mxu1  ;;  %v1019_v62 = vpop.f32.mrf.mxu0 }
 0x166   : > { %v1067_v63 = vadd.f32 %v1054_v53, %v1039_v60  ;;  %v933_v0 = vadd.f32 %v1924_v61, %v1914_v48  ;;  %v1038_v1 = vadd.f32 %v1019_v62, %v918_v59 }
 0x167   : > { %v927_v3 = vpop.f32.mrf.mxu1  ;;  %v1932_v4 = vpop.f32.mrf.mxu0 }
 0x168   : > { %v1071_v5 = vmax.f32 %v1067_v63, 0.0  ;;  %v1066_v6 = vadd.f32 %v1049_v47, %v1038_v1  ;;  %v928_v7 = vadd.f32 %v927_v3, %v830_v51  ;;  %v1041_v8 = vadd.f32 %v1932_v4, %v933_v0 }
 0x169   : > { %v1029_v9 = vpop.f32.mrf.mxu0  ;;  %v1939_v10 = vpop.f32.mrf.mxu1 }
 0x16a   : > { %1075 = vst [vmem:[%s2716_s4 + $0x8] sm:$0xff] %v1071_v5  ;;  %v1070_v11 = vmax.f32 %v1066_v6, 0.0  ;;  %v1069_v12 = vadd.f32 %v1064_v2, %v1041_v8  ;;  %v1040_v13 = vadd.f32 %v1029_v9, %v928_v7  ;;  %v1170_v15 = vadd.f32 %v1939_v10, %v1090_v49 }
 0x16b   : > { %v1164_v16 = vpop.f32.mrf.mxu1 }
 0x16c   : > { %1074 = vst [vmem:[%s2716_s4] sm:$0xff] %v1070_v11  ;;  %v1073_v17 = vmax.f32 %v1069_v12, 0.0  ;;  %v1068_v18 = vadd.f32 %v1059_v14, %v1040_v13  ;;  %v1953_v19 = vpop.f32.mrf.mxu0  ;;  %v1165_v20 = vadd.f32 %v1164_v16, %v1085_v58 }
 0x16d   : > { %v1341_v24 = vadd.f32 %v1953_v19, %v1170_v15 }
 0x16e   : > { %1077 = vst [vmem:[%s2716_s4 + $0x18] sm:$0xff] %v1073_v17  ;;  %v1072_v21 = vmax.f32 %v1068_v18, 0.0  ;;  %v1946_v22 = vpop.f32.mrf.mxu1  ;;  %v1331_v23 = vpop.f32.mrf.mxu0 }
 0x16f   : > { %v1259_v25 = vadd.f32 %v1946_v22, %v1170_v15  ;;  %v1340_v28 = vadd.f32 %v1331_v23, %v1165_v20  ;;  %v1343_v31 = vmax.f32 %v1341_v24, 0.0 }
 0x170   : > { %1076 = vst [vmem:[%s2716_s4 + $0x10] sm:$0xff] %v1072_v21  ;;  %v1249_v26 = vpop.f32.mrf.mxu1  ;;  %s2344_s4 = smov [#allocation12]  }
 0x171   : > { %v1261_v27 = vmax.f32 %v1259_v25, 0.0  ;;  %v1258_v29 = vadd.f32 %v1249_v26, %v1165_v20  ;;  %v1342_v36 = vmax.f32 %v1340_v28, 0.0  ;;  %s2198_s10 = sshll.u32 %s2344_s4, 4  ;;  %s2199_s10 = int_to_ptr.vmem [resolvable:$false] %s2198_s10 }
 0x172   : > { %v1960_v30 = vpop.f32.mrf.mxu1  ;;  %s2200_s16 = scalar_lea.vmem %s2199_s10, 1024  ;;  %p2201_p12 = scmp.lt.s32.totalorder %s2739_s28, %s2199_s10 }
 0x173   : > { %v1260_v32 = vmax.f32 %v1258_v29, 0.0  ;;  %v1425_v33 = vadd.f32 %v1960_v30, %v1170_v15  ;;  %v1345_v35 = vmax.f32 %v1261_v27, %v1343_v31  ;;  %p2202_p13 = scmp.lt.s32.totalorder %s2200_s16, %s2194_s25 }
 0x174   : > { %v1415_v34 = vpop.f32.mrf.mxu1 }
 0x175   : > { %v1427_v37 = vmax.f32 %v1425_v33, 0.0  ;;  %v1424_v38 = vadd.f32 %v1415_v34, %v1165_v20  ;;  %v1344_v39 = vmax.f32 %v1260_v32, %v1342_v36  ;;  %p2203_p11 = por %p2202_p13, %p2201_p12 }
 0x177   : > { %v1429_v40 = vmax.f32 %v1345_v35, %v1427_v37  ;;  %v1426_v41 = vmax.f32 %v1424_v38, 0.0  ;;  %p2204_p6 = pnand %p2203_p11, %p2197_p10 }
 0x179   : > { %v1428_v42 = vmax.f32 %v1344_v39, %v1426_v41  ;;  %1961 = vmatprep.subr.mxu0 %v1429_v40 }
 0x17a   : > { %1962 = vmatpush3.msra.mxu0 %v1429_v40 }
 0x17b   : > { %1963 = vmatprep.subr.mxu0 %v1428_v42 }
 0x17c   : > { %1964 = vmatpush3.msra.mxu0 %v1428_v42 }
 0x17d   : > { %1966 = vmatmul.mubr.msk.f32.vlgmr.msra.gmra.mxu0 %vm741_vm0, %v1431_v43 }
 0x17e   : > { %1968 = vmatprep.mubr.msk.f32.mxu0 %vm741_vm0, %v1432_v44 }
 0x181   : > { %1969 = vmatmul.mubr.msk.f32.gmra.mxu0 %vm741_vm0, %v1433_v45 }
 0x182   : > { %2207 = shalt.err (!%p2204_p6)
}
 0x183   : > { %s2208_s17 = scalar_lea.hbm %s2747_s20, 512  ;;  %s2212_s9 = scalar_lea.hbm %s2921_s6, 2048 }
 0x184   : > { %p2209_p8 = scmp.ne.s32.totalorder %s2747_s20, %s2208_s17  ;;  %p2213_p9 = scmp.lt.s32.totalorder %s2747_s20, %s2921_s6 }
 0x185   : > { %p2214_p4 = scmp.lt.s32.totalorder %s2212_s9, %s2208_s17 }
 0x186   : > { %p2210_p3 = pnand %p2209_p8, %p2922_p1 }
 0x187   : > { %p2215_p5 = por %p2214_p4, %p2213_p9 }
 0x188   : > { %p2211_p2 = pneg %p2210_p3 }
 0x18a   : > { %p2216_p0 = pnand %p2215_p5, %p2211_p2 }
 0x18c   : > { %2219 = shalt.err (!%p2216_p0)
}
 0x18d   : > { %s2873_s25 = smov 128   ;;  %s2346_s4 = smov 256   ;;  %v1446_v46 = vpop.permute.xlu1 %1445  ;;  %v1441_v47 = vpop.permute.xlu0 %1440 }
 0x18e   : > { %s2347_s10 = smov 8   ;;  %s727_s16 = scalar_lea.vmem [#allocation13], %s1828_s26 }
 0x18f   : > { %1990 = dma.vmem_to_hbm [thread:$0]  (%p2922_p1), %s2739_s28, 512, %s2747_s20, %s1564_s22, %s2873_s25, %s2346_s4, %s2347_s10  }
 0x190   : > { %s1600_s17 = sshll.u32 %s727_s16, 4  ;;  %s2923_s20 = sld [smem:[#allocation42_spill]]  ;;  %s2777_s17 = int_to_ptr.vmem [resolvable:$true] %s1600_s17 }
 0x191   : > { %v1456_v53 = vpop.permute.xlu1 %1455  ;;  %v1451_v57 = vpop.permute.xlu0 %1450  ;;  %s1569_s7 = scalar_lea.sflag [#allocation14], %s2585_s1  ;;  %s2220_s9 = scalar_lea.vmem %s2777_s17, 512 }
 0x192   : > { %p2221_p7 = scmp.ne.s32.totalorder %s2777_s17, %s2220_s9  ;;  %s2348_s24 = smov [#allocation13]  }
 0x193   : > { %s2224_s14 = sshll.u32 %s2348_s24, 4  ;;  %s2225_s14 = int_to_ptr.vmem [resolvable:$false] %s2224_s14 }
 0x194   : > { %p2222_p10 = pnand %p2221_p7, %p2922_p1  ;;  %s2226_s25 = scalar_lea.vmem %s2225_s14, 1024 }
 0x195   : > { %p2227_p13 = scmp.lt.s32.totalorder %s2777_s17, %s2225_s14  ;;  %p2228_p11 = scmp.lt.s32.totalorder %s2226_s25, %s2220_s9 }
 0x196   : > { %s2924_s22 = smov %s2923_s20  ;;  %s2784_s0 = scalar_lea.hbm %s2923_s20, %s1861_s29 }
 0x197   : > { %p2223_p12 = pneg %p2222_p10  ;;  %p2229_p6 = por %p2228_p11, %p2227_p13 }
 0x199   : > { %p2230_p8 = pnand %p2229_p6, %p2223_p12 }
 0x23d   : > { %v1967_v48 = vpop.f32.mrf.mxu0 }
 0x23e   : > { %v1542_v49 = vadd.f32 %v1967_v48, %v1446_v46 }
 0x23f   : > { %v1536_v50 = vpop.f32.mrf.mxu0 }
 0x240   : > { %v1556_v51 = vmax.f32 %v1542_v49, 0.0  ;;  %v1537_v52 = vadd.f32 %v1536_v50, %v1441_v47 }
 0x241   : > { %v1970_v54 = vpop.f32.mrf.mxu0 }
 0x242   : > { %1560 = vst [vmem:[%s727_s16 + $0x8] sm:$0xff] %v1556_v51  ;;  %v1555_v55 = vmax.f32 %v1537_v52, 0.0  ;;  %v1552_v56 = vadd.f32 %v1970_v54, %v1456_v53 }
 0x243   : > { %v1546_v58 = vpop.f32.mrf.mxu0 }
 0x244   : > { %1559 = vst [vmem:[%s727_s16] sm:$0xff] %v1555_v55  ;;  %v1558_v59 = vmax.f32 %v1552_v56, 0.0  ;;  %v1547_v60 = vadd.f32 %v1546_v58, %v1451_v57 }
 0x246   : > { %1562 = vst [vmem:[%s727_s16 + $0x18] sm:$0xff] %v1558_v59  ;;  %v1557_v61 = vmax.f32 %v1547_v60, 0.0 }
 0x248   : > { %1561 = vst [vmem:[%s727_s16 + $0x10] sm:$0xff] %v1557_v61 }
 0x249   : > { %2233 = shalt.err (!%p2230_p8)
}
 0x24a   : > { %s2234_s15 = scalar_lea.hbm %s2784_s0, 512  ;;  %s2238_s16 = scalar_lea.hbm %s2924_s22, 2048 }
 0x24b   : > { %p2235_p3 = scmp.ne.s32.totalorder %s2784_s0, %s2234_s15  ;;  %p2239_p4 = scmp.lt.s32.totalorder %s2784_s0, %s2924_s22 }
 0x24c   : > { %p2240_p5 = scmp.lt.s32.totalorder %s2238_s16, %s2234_s15 }
 0x24d   : > { %p2236_p2 = pnand %p2235_p3, %p2922_p1 }
 0x24e   : > { %p2241_p0 = por %p2240_p5, %p2239_p4 }
 0x24f   : > { %p2237_p9 = pneg %p2236_p2 }
 0x251   : > { %p2242_p7 = pnand %p2241_p0, %p2237_p9 }
 0x253   : > { %2245 = shalt.err (!%p2242_p7)
}
 0x254   : > { %s2925_s25 = smov 128  }
 0x255   : > { %1991 = dma.vmem_to_hbm [thread:$0]  (%p2922_p1), %s2777_s17, 512, %s2784_s0, %s1569_s7, %s2925_s25, %s2346_s4, %s2347_s10  }
 0x256 PF: > { %s2926_s20 = sld [smem:[#allocation25_spill]] }
 0x257   : > { %s2927_s9 = sld [smem:[#allocation21_spill]] }
 0x258   : > { %s2928_s24 = sld [smem:[#allocation29_spill]] }
 0x25c   : > { %p2012_p10 = scmp.ge.s32.totalorder %s2926_s20, 2 }
 0x25d   : > { %s1615_s14 = sand.u32 1, %s2927_s9  }
 0x25e   : > { %p2929_p12 = scmp.ne.s32.totalorder %s2928_s24, 0  ;;  %s1616_s15 = scalar_lea.sflag [#allocation5], %s1615_s14 }
 0x260   : > { %p2002_p13 = pnand %p2012_p10, %p2929_p12 }
 0x262   : > { %p2003_p11 = pneg %p2002_p13 }
 0x264   : > { %2295 = dma.done.wait (%p2003_p11), %s1616_s15, 512  }
 0x265   : > { %2297 = vsyncadd (%p2003_p11), %s1616_s15, 4294966784  ;;  %s1625_s1 = scalar_lea.sflag [#allocation14], %s1615_s14 }
 0x266   : > { %2299 = dma.done.wait (%p2003_p11), %s1625_s1, 512  }
 0x267   : > { %2301 = vsyncadd (%p2003_p11), %s1625_s1, 4294966784  ;;  %s38_s20 = sadd.s32 1, %s2926_s20   ;;  %s2930_s23 = sld [smem:[#allocation22_spill]] }
 0x268   : > { %p35_p6 = scmp.ge.s32.totalorder %s38_s20, 6   ;;  %s2931_s15 = sld [smem:[#allocation30_spill]] }
 0x269   : > { %s2932_s4 = sld [smem:[#allocation26_spill]]  ;;  %s2934_s29 = smov %s2308_s30 }
 0x26a   : > { %s2933_s10 = sld [smem:[#allocation27_spill]]  ;;  %s2936_s16 = smov %s2324_s18 }
 0x26b   : > { %s2937_s17 = smov %s2328_s19 }
 0x26c   :  { %37 = sbr.rel (!%p35_p6) target bundleno = 25 (0x19), region = 249 }
 0x26d   : > { %s2935_s30 = smov %s2930_s23 }
 0x26f   : > { %s2938_s18 = smov %s2932_s4 }
 0x270   : > { %s2939_s19 = smov %s2933_s10 }
 0x271   :  { %1630 = vsyncpa [#allocation4], 1 }
 0x272   :  { %1632 = vsyncpa [#allocation4 + $0x1], 1 }
 0x273   :  { %1633 = vsyncpa [#allocation7], 1 }
 0x274   :  { %1635 = vsyncpa [#allocation7 + $0x1], 1 }
 0x275   :  { %1636 = vsyncpa [#allocation11], 1 }
 0x276   :  { %1637 = vsyncpa [#allocation5], 1 }
 0x277   :  { %1639 = vsyncpa [#allocation5 + $0x1], 1 }
 0x278   :  { %1640 = vsyncpa [#allocation14], 1 }
 0x279   :  { %1642 = vsyncpa [#allocation14 + $0x1], 1 }

</bundles_post_ra>
